<compile_context>
chip_gen: v7x
topology: tpu7x:2x2x1
jax: 0.10.0
libtpu: 0.0.40
codegen_flags: <defaults>
</compile_context>

<pallas_src>
import math

import jax
import jax.numpy as jnp
import numpy as np
from jax import lax
from jax.experimental import pallas as pl
from jax.experimental.pallas import tpu as pltpu


def _space_model_kernel(x_ref, w_all_ref, spaces_ref, ssum_ref):
    # x_ref      : (B, tS, E)        one sequence tile of the (zero-padded) input
    # w_all_ref  : (CL_pad, E)       all concept-space weights stacked + lane-padded
    # spaces_ref : (B, tS, CL_pad)   lane-dense tanh projections, this tile
    # ssum_ref   : (1, B, CL_pad)    this tile's sum over its S rows
    B, tS, E = x_ref.shape
    CLp = w_all_ref.shape[0]

    # Flatten to 2-D so Mosaic emits one big MXU matmul with M = B*tS.
    x2d = x_ref[...].reshape(B * tS, E)                       # layout-free (tS % 8 == 0)
    proj2d = jnp.tanh(
        lax.dot_general(
            x2d, w_all_ref[...],
            dimension_numbers=(((1,), (1,)), ((), ())),       # contract E
            preferred_element_type=jnp.float32,
        )
    )                                                         # (B*tS, CL_pad)
    proj = proj2d.reshape(B, tS, CLp)

    spaces_ref[...] = proj.astype(spaces_ref.dtype)
    # Per-tile sequence sum; mean's 1/S, classifier matmul and bias live in the wrapper.
    ssum_ref[0] = jnp.sum(proj, axis=1).astype(ssum_ref.dtype)


def _choose_s_tile(B, S, E, CLp, budget_bytes=20 << 20, max_tile=1024):
    """VMEM-budget-aware S-tile (multiple of 8)."""
    s_ceil8 = ((S + 7) // 8) * 8
    per_row = 2 * B * (E + CLp) * 4            # double-buffered x + spaces rows (f32)
    fixed = 2 * CLp * E * 4 + 2 * B * CLp * 4  # resident weight block + ssum blocks
    avail = max(budget_bytes - fixed, 8 * per_row)
    tS = min(max_tile, (avail // per_row) // 8 * 8, s_ceil8)
    tS = max(int(tS), 8)
    # Prefer >= 2 tiles when there is enough work (v7x has 2 TensorCores/chip).
    if tS >= s_ceil8 and s_ceil8 >= 512:
        tS = ((s_ceil8 // 2 + 7) // 8) * 8
    return tS


def space_model_for_classification(x, w_spaces, wc, bc):
    """
    x        : (B, S, E)     float32
    w_spaces : (C, L, E)     float32  -- stacked Linear(no-bias) weights of each space
    wc       : (C_out, C*L)  float32  -- classifier Linear weight (PyTorch layout)
    bc       : (C_out,)      float32  -- classifier Linear bias
    returns (logits (B, C_out), concept_spaces (C, B, S, L))
    """
    B, S, E = x.shape
    C, L, _ = w_spaces.shape
    CL = C * L
    CLp = ((CL + 127) // 128) * 128            # lane-dense spaces output width

    # Stack all concept-space weights (row c*L + l is latent l of space c),
    # zero-pad rows to CL_pad (padded latents are tanh(0) == 0).
    w_all = w_spaces.reshape(CL, E).astype(jnp.float32)
    if CLp > CL:
        w_all = jnp.pad(w_all, ((0, CLp - CL), (0, 0)))

    tS = _choose_s_tile(B, S, E, CLp)
    n_tiles = pl.cdiv(S, tS)
    S_pad = n_tiles * tS
    x_in = x.astype(jnp.float32)
    if S_pad > S:
        # Zero rows project to tanh(0) = 0 -> contribute nothing to ssum / mean.
        x_in = jnp.pad(x_in, ((0, 0), (0, S_pad - S), (0, 0)))

    grid_spec = pltpu.PrefetchScalarGridSpec(
        num_scalar_prefetch=0,
        grid=(n_tiles,),
        in_specs=[
            # x: one S-tile per grid step.
            pl.BlockSpec((B, tS, E), lambda s: (0, s, 0)),
            # Grid-invariant weights (constant index_map -> fetched once, kept resident).
            pl.BlockSpec((CLp, E), lambda s: (0, 0)),
        ],
        out_specs=[
            # Lane-dense spaces tile: last dim is CL_pad (multiple of 128).
            pl.BlockSpec((B, tS, CLp), lambda s: (0, s, 0)),
            # Private per-tile sequence sum (no cross-step accumulator -> no race).
            pl.BlockSpec((1, B, CLp), lambda s: (s, 0, 0)),
        ],
    )

    spaces_flat, ssum = pl.pallas_call(
        _space_model_kernel,
        grid_spec=grid_spec,
        out_shape=[
            jax.ShapeDtypeStruct((B, S_pad, CLp), jnp.float32),
            jax.ShapeDtypeStruct((n_tiles, B, CLp), jnp.float32),
        ],
        compiler_params=pltpu.CompilerParams(
            # Disjoint output blocks per step -> fully parallel (megacore sharding).
            dimension_semantics=("parallel",),
            # Above v5e's 16 MiB scoped default, below v7x's 64 MiB physical VMEM.
            vmem_limit_bytes=48 * 1024 * 1024,
        ),
    )(x_in, w_all)

    # Tiny reductions / layout plumbing in the wrapper (not worth kernel time).
    avg = (jnp.sum(ssum, axis=0)[:, :CL]) * (1.0 / S)           # (B, CL)
    logits = avg @ wc.T + bc                                    # (B, C_out)
    concept_spaces = jnp.transpose(
        spaces_flat[:, :S, :CL].reshape(B, S, C, L), (2, 0, 1, 3)   # -> (C, B, S, L)
    )
    return logits, concept_spaces


def _reference(x, w_spaces, wc, bc):
    projected = [jnp.tanh(x @ w.T) for w in w_spaces]           # list of (B, S, L)
    avg = [p.mean(axis=1) for p in projected]                   # list of (B, L)
    concept_logits = jnp.concatenate(avg, axis=-1)              # (B, C*L)
    logits = concept_logits @ wc.T + bc                         # (B, C_out)
    return logits, jnp.stack(projected, axis=0)


if __name__ == "__main__":
    # Small shapes consistent with the module's forward (x: [batch, seq, n_embed]).
    B, S = 2, 8
    n_embed, n_latent, n_concept_spaces = 32, 16, 2

    key = jax.random.PRNGKey(0)
    k_x, k_w, k_wc, k_bc = jax.random.split(key, 4)

    x = jax.random.normal(k_x, (B, S, n_embed), dtype=jnp.float32)
    w_spaces = 0.1 * jax.random.normal(
        k_w, (n_concept_spaces, n_latent, n_embed), dtype=jnp.float32
    )
    wc = 0.1 * jax.random.normal(
        k_wc, (n_concept_spaces, n_concept_spaces * n_latent), dtype=jnp.float32
    )
    bc = 0.1 * jax.random.normal(k_bc, (n_concept_spaces,), dtype=jnp.float32)

    logits, spaces = jax.jit(space_model_for_classification)(x, w_spaces, wc, bc)
    jax.block_until_ready((logits, spaces))

    ref_logits, ref_spaces = _reference(x, w_spaces, wc, bc)
    np.testing.assert_allclose(np.asarray(logits), np.asarray(ref_logits),
                               rtol=1e-5, atol=1e-5)
    np.testing.assert_allclose(np.asarray(spaces), np.asarray(ref_spaces),
                               rtol=1e-5, atol=1e-5)

    print("KERNEL_OK")
</pallas_src>

<mosaic_0001>
module attributes {stable_mosaic.version = 11 : i64} {
  func.func @_space_model_kernel(%arg0: i32, %arg1: memref<2x8x32xf32, #tpu.memory_space<vmem>>, %arg2: memref<128x32xf32, #tpu.memory_space<vmem>>, %arg3: memref<2x8x128xf32, #tpu.memory_space<vmem>>, %arg4: memref<1x2x128xf32, #tpu.memory_space<vmem>>) attributes {dimension_semantics = [#tpu.dimension_semantics<parallel>], iteration_bounds = array<i64: 1>, scalar_prefetch = 0 : i64, scratch_operands = 0 : i64, tpu.core_type = #tpu.core_type<tc>, window_params = [{transform_indices = @transform_0, window_bounds = array<i64: 2, 8, 32>}, {pipeline_mode = #tpu.pipeline_mode<synchronous>, transform_indices = @transform_1, window_bounds = array<i64: 128, 32>}, {transform_indices = @transform_2, window_bounds = array<i64: 2, 8, 128>}, {transform_indices = @transform_3, window_bounds = array<i64: 1, 2, 128>}]} {
    %c0 = arith.constant 0 : index
    %c0_0 = arith.constant 0 : index
    %c0_1 = arith.constant 0 : index
    %0 = vector.load %arg1[%c0, %c0_0, %c0_1] : memref<2x8x32xf32, #tpu.memory_space<vmem>>, vector<2x8x32xf32>
    %1 = vector.shape_cast %0 : vector<2x8x32xf32> to vector<16x32xf32>
    %c0_2 = arith.constant 0 : index
    %c0_3 = arith.constant 0 : index
    %2 = vector.load %arg2[%c0_2, %c0_3] : memref<128x32xf32, #tpu.memory_space<vmem>>, vector<128x32xf32>
    %cst = arith.constant dense<0.000000e+00> : vector<16x128xf32>
    %3 = tpu.matmul %1, %2, %cst {dimension_numbers = #tpu.dot_dimension_numbers<[1], [1], [0], [0], [0, 0, 1, 0], [], []>} : vector<16x32xf32>, vector<128x32xf32>, vector<16x128xf32> -> vector<16x128xf32>
    %4 = math.tanh %3 : vector<16x128xf32>
    %5 = vector.shape_cast %4 : vector<16x128xf32> to vector<2x8x128xf32>
    %c0_4 = arith.constant 0 : index
    %c0_5 = arith.constant 0 : index
    %c0_6 = arith.constant 0 : index
    %6 = vector.load %arg3[%c0_4, %c0_5, %c0_6] : memref<2x8x128xf32, #tpu.memory_space<vmem>>, vector<2x8x128xf32>
    tpu.vector_store %arg3[%c0_4, %c0_5, %c0_6], %5 {strides = array<i32>} : memref<2x8x128xf32, #tpu.memory_space<vmem>>, vector<2x8x128xf32>,
    %cst_7 = arith.constant dense<0.000000e+00> : vector<2x128xf32>
    %7 = vector.multi_reduction <add>, %5, %cst_7 [1] : vector<2x8x128xf32> to vector<2x128xf32>
    %c0_8 = arith.constant 0 : index
    %c0_9 = arith.constant 0 : index
    %c0_10 = arith.constant 0 : index
    %8 = vector.load %arg4[%c0_8, %c0_9, %c0_10] : memref<1x2x128xf32, #tpu.memory_space<vmem>>, vector<1x2x128xf32>
    %9 = vector.shape_cast %8 : vector<1x2x128xf32> to vector<2x128xf32>
    %10 = vector.shape_cast %7 : vector<2x128xf32> to vector<1x2x128xf32>
    tpu.vector_store %arg4[%c0_8, %c0_9, %c0_10], %10 {strides = array<i32>} : memref<1x2x128xf32, #tpu.memory_space<vmem>>, vector<1x2x128xf32>,
    return
  }
  func.func @transform_0(%arg0: i32) -> (i32, i32, i32) {
    %c0_i32 = arith.constant 0 : i32
    %c0_i32_0 = arith.constant 0 : i32
    %c0_i32_1 = arith.constant 0 : i32
    return %c0_i32, %arg0, %c0_i32_0 : i32, i32, i32
  }
  func.func @transform_1(%arg0: i32) -> (i32, i32) {
    %c0_i32 = arith.constant 0 : i32
    %c0_i32_0 = arith.constant 0 : i32
    %c0_i32_1 = arith.constant 0 : i32
    return %c0_i32, %c0_i32_0 : i32, i32
  }
  func.func @transform_2(%arg0: i32) -> (i32, i32, i32) {
    %c0_i32 = arith.constant 0 : i32
    %c0_i32_0 = arith.constant 0 : i32
    %c0_i32_1 = arith.constant 0 : i32
    return %c0_i32, %arg0, %c0_i32_0 : i32, i32, i32
  }
  func.func @transform_3(%arg0: i32) -> (i32, i32, i32) {
    %c0_i32 = arith.constant 0 : i32
    %c0_i32_0 = arith.constant 0 : i32
    %c0_i32_1 = arith.constant 0 : i32
    return %arg0, %c0_i32, %c0_i32_0 : i32, i32, i32
  }
}

</mosaic_0001>

<bundles_post_ra>
// kernel: space_model_for_classification.1
= control target key start
LH: loop header
LB: loop body
LE: loop exit
PB: predicated region body
PF: predicated region fallthrough
CT: control target
= control target key end

     0   :  { %vm31_vm0 = vcmask 261120   ;;  %vm179_vm2 = vcmask 1041409   ;;  %s437_s1 = inlined_call_operand.vmem [shape: f32[128,32], index: 1, kind: input, shape index: {}]   ;;  %s438_s0 = inlined_call_operand.vmem [shape: f32[2,8,32], index: 0, kind: input, shape index: {}]   ;;  %s439_s2 = inlined_call_operand.vmem [shape: f32[2,8,128], index: 2, kind: output, shape index: {0}]   ;;  %s440_s3 = inlined_call_operand.vmem [shape: f32[1,2,128], index: 3, kind: output, shape index: {1}]  }
   0x1   :  { %v15_v0 = vld [vmem:[%s437_s1] sm:$0xff]  ;;  %v16_v1 = vld [vmem:[%s437_s1 + $0x8] sm:$0xff]  ;;  %vm342_vm1 = vmpackc.low %vm31_vm0, %vm31_vm0 }
   0x2   :  { %v262_v3 = vpack.c.bf16 %v16_v1, %v15_v0  ;;  %v17_v4 = vld [vmem:[%s437_s1 + $0x10] sm:$0xff]  ;;  %v18_v5 = vld [vmem:[%s437_s1 + $0x18] sm:$0xff]  ;;  %v13_v7 = vld [vmem:[%s438_s0] sm:$0xff] }
   0x3   :  { %v268_v6 = vpack.c.bf16 %v18_v5, %v17_v4  ;;  %v19_v8 = vld [vmem:[%s437_s1 + $0x20] sm:$0xff]  ;;  %v20_v9 = vld [vmem:[%s437_s1 + $0x28] sm:$0xff]  ;;  %259 = vmatprep.mubr.msk.f32.mxu0 %vm31_vm0, %v13_v7  ;;  %v21_v11 = vld [vmem:[%s437_s1 + $0x30] sm:$0xff] }
   0x4   :  { %264 = vmatprep.subr.msk.bf16.mxu0 %vm342_vm1, %v262_v3  ;;  %v274_v10 = vpack.c.bf16 %v20_v9, %v19_v8  ;;  %v22_v12 = vld [vmem:[%s437_s1 + $0x38] sm:$0xff]  ;;  %v23_v14 = vld [vmem:[%s437_s1 + $0x40] sm:$0xff]  ;;  %v24_v15 = vld [vmem:[%s437_s1 + $0x48] sm:$0xff] }
   0x5   :  { %267 = vmatpush3.bf16.xpose.msk.msra.mxu0 %vm342_vm1, %v262_v3  ;;  %v280_v13 = vpack.c.bf16 %v22_v12, %v21_v11  ;;  %v286_v16 = vpack.c.bf16 %v24_v15, %v23_v14  ;;  %v25_v17 = vld [vmem:[%s437_s1 + $0x50] sm:$0xff]  ;;  %v26_v18 = vld [vmem:[%s437_s1 + $0x58] sm:$0xff]  ;;  %v27_v20 = vld [vmem:[%s437_s1 + $0x60] sm:$0xff] }
   0x6   :  { %270 = vmatprep.subr.msk.bf16.mxu0 %vm342_vm1, %v268_v6  ;;  %v292_v19 = vpack.c.bf16 %v26_v18, %v25_v17  ;;  %v28_v21 = vld [vmem:[%s437_s1 + $0x68] sm:$0xff]  ;;  %v29_v23 = vld [vmem:[%s437_s1 + $0x70] sm:$0xff]  ;;  %v30_v24 = vld [vmem:[%s437_s1 + $0x78] sm:$0xff] }
   0x7   :  { %v298_v22 = vpack.c.bf16 %v28_v21, %v27_v20  ;;  %v304_v25 = vpack.c.bf16 %v30_v24, %v29_v23  ;;  %v14_v26 = vld [vmem:[%s438_s0 + $0x8] sm:$0xff] }
   0xd   :  { %273 = vmatpush3.bf16.xpose.msk.msra.mxu0 %vm342_vm1, %v268_v6 }
   0xe   :  { %276 = vmatprep.subr.msk.bf16.mxu0 %vm342_vm1, %v274_v10 }
  0x15   :  { %279 = vmatpush3.bf16.xpose.msk.msra.mxu0 %vm342_vm1, %v274_v10 }
  0x16   :  { %282 = vmatprep.subr.msk.bf16.mxu0 %vm342_vm1, %v280_v13 }
  0x1d   :  { %285 = vmatpush3.bf16.xpose.msk.msra.mxu0 %vm342_vm1, %v280_v13 }
  0x1e   :  { %288 = vmatprep.subr.msk.bf16.mxu0 %vm342_vm1, %v286_v16 }
  0x25   :  { %291 = vmatpush3.bf16.xpose.msk.msra.mxu0 %vm342_vm1, %v286_v16 }
  0x26   :  { %294 = vmatprep.subr.msk.bf16.mxu0 %vm342_vm1, %v292_v19 }
  0x2d   :  { %297 = vmatpush3.bf16.xpose.msk.msra.mxu0 %vm342_vm1, %v292_v19 }
  0x2e   :  { %300 = vmatprep.subr.msk.bf16.mxu0 %vm342_vm1, %v298_v22 }
  0x35   :  { %303 = vmatpush3.bf16.xpose.msk.msra.mxu0 %vm342_vm1, %v298_v22 }
  0x36   :  { %306 = vmatprep.subr.msk.bf16.mxu0 %vm342_vm1, %v304_v25 }
  0x3d   :  { %309 = vmatpush3.bf16.xpose.msk.msra.mxu0 %vm342_vm1, %v304_v25 }
  0x44   :  { %260 = vmatmul.mubr.msk.f32.vlgmr.msra.gmra.mrb[0].mxu0 %vm31_vm0, %v14_v26 }
 0x117   :  { %v261_v27 = vpop.f32.mrb[0].mxu0 }
 0x118   :  { %310 = vtanh.f32 %v261_v27  ;;  %v152_v28 = vpop.f32.mrb[1].mxu0 }
 0x119   :  { %312 = vtanh.f32 %v152_v28 }
 0x122   :  { %v311_v29 = vpop.eup %310 }
 0x123   :  { %v313_v30 = vpop.eup %312  ;;  %164 = vst [vmem:[%s439_s2 + $0x8] sm:$0xff] %v311_v29  ;;  %v171_v31 = vrot.slane %v311_v29, 4 }
 0x124   :  { %163 = vst [vmem:[%s439_s2] sm:$0xff] %v313_v30  ;;  %v165_v32 = vrot.slane %v313_v30, 4 }
 0x125   :  { %v172_v33 = vadd.f32 %v311_v29, %v171_v31 }
 0x126   :  { %v166_v34 = vadd.f32 %v313_v30, %v165_v32 }
 0x127   :  { %v173_v35 = vrot.slane %v172_v33, 2 }
 0x128   :  { %v167_v36 = vrot.slane %v166_v34, 2 }
 0x129   :  { %v174_v37 = vadd.f32 %v173_v35, %v172_v33 }
 0x12a   :  { %v168_v38 = vadd.f32 %v167_v36, %v166_v34 }
 0x12b   :  { %v175_v39 = vrot.slane %v174_v37, 1 }
 0x12c   :  { %v169_v40 = vrot.slane %v168_v38, 1 }
 0x12d   :  { %v176_v41 = vadd.f32 %v175_v39, %v174_v37 }
 0x12e   :  { %v170_v42 = vadd.f32 %v169_v40, %v168_v38 }
 0x130   :  { %v180_v43 = vsel %vm179_vm2, %v176_v41, %v170_v42 }
 0x131   :  { %182 = vst [vmem:[%s440_s3] sm:$0x3] %v180_v43 }

</bundles_post_ra>
